<compile_context>
chip_gen: v7x
topology: tpu7x:2x2x1
jax: 0.10.0
libtpu: 0.0.40
codegen_flags: <defaults>
</compile_context>

<pallas_src>
import functools

import jax
import jax.numpy as jnp
from jax import lax
from jax.experimental import pallas as pl
from jax.experimental.pallas import tpu as pltpu


def _tpu_generation():
    """Best-effort TPU generation (4/5/6/7); 0 if unknown."""
    try:
        kind = jax.devices()[0].device_kind.lower()
    except Exception:
        return 0
    for g in (7, 6, 5, 4):
        if f"v{g}" in kind:
            return g
    if "trillium" in kind:
        return 6
    return 0


_TPU_GEN = _tpu_generation()
# bf16 EUP (exp/log) exists on v6e/v7x; keep f32 transcendentals on v5e/older.
_BF16_SOFTPLUS = _TPU_GEN >= 6
# Bigger tiles amortize per-grid-step overhead; cap lower on v7x (64 MiB/TC).
_DEFAULT_TILE_N = 16384 if _TPU_GEN == 7 else 32768
_VMEM_BUDGET = (40 << 20) if _TPU_GEN == 7 else (96 << 20)


def _dpsh_likelihood_kernel(u_ref, y_ref, bank_ref, out_ref, acc_ref, *,
                            bit, tail, bf16_softplus):
    """Grid = (num_bank_tiles,); each step consumes one fused bank tile.

    u_ref    : (B, bit)            VMEM, resident across the grid (bf16)
    y_ref    : (B, n_class)        VMEM, resident across the grid (bf16)
    bank_ref : (bit+n_class, TN)   VMEM tile of the fused [U.T ; Y.T] bank
    out_ref  : (8, 128)            lane-dense scalar broadcast (f32)
    acc_ref  : (B, TN) f32         scratch accumulator
    """
    j = pl.program_id(0)
    last = pl.num_programs(0) - 1

    @pl.when(j == 0)
    def _():
        acc_ref[...] = jnp.zeros_like(acc_ref)

    bank = bank_ref[...]                       # (bit + n_class, TN) bf16
    u_bank = bank[:bit, :]                     # (bit, TN)
    y_bank = bank[bit:, :]                     # (n_class, TN)

    # inner_product = 0.5 * (u @ U_tile)  -> (B, TN), f32 accumulation on MXU,
    # canonical (no-transpose) operand order.
    ip = lax.dot_general(
        u_ref[...], u_bank,
        dimension_numbers=(((1,), (0,)), ((), ())),
        preferred_element_type=jnp.float32,
    ) * 0.5

    # s = (y @ Y_tile > 0)               -> (B, TN); 0/1 one-hot dot is exact.
    yy = lax.dot_general(
        y_ref[...], y_bank,
        dimension_numbers=(((1,), (0,)), ((), ())),
        preferred_element_type=jnp.float32,
    )
    s = (yy > 0.0).astype(jnp.float32)

    # Stable softplus form: log(1 + exp(-|ip|)) + max(ip, 0) - s * ip
    neg_abs = -jnp.abs(ip)
    if bf16_softplus:
        # exp/log in bf16 on the EUP (v6e/v7x); accumulate in f32.
        sp = jnp.log(1.0 + jnp.exp(neg_abs.astype(jnp.bfloat16)))
        sp = sp.astype(jnp.float32)
    else:
        sp = jnp.log1p(jnp.exp(neg_abs))
    ll = sp + jnp.maximum(ip, 0.0) - s * ip

    if tail == 0:
        # All tiles are full: mask-free fast path everywhere.
        acc_ref[...] += ll
    else:
        # Only the last tile has lanes past num_train (DMA'd contents there
        # are unspecified); interior tiles keep the mask-free fast path.
        @pl.when(j < last)
        def _():
            acc_ref[...] += ll

        @pl.when(j == last)
        def _():
            lanes = lax.broadcasted_iota(jnp.int32, ll.shape, 1)
            acc_ref[...] += jnp.where(lanes < tail, ll, 0.0)

    @pl.when(j == last)
    def _():
        out_ref[...] = jnp.broadcast_to(jnp.sum(acc_ref[...]), out_ref.shape)


def _likelihood_sum(u, y, bank, *, bit, tile_n=None):
    """Sum of the per-pair likelihood loss over all (batch, num_train) pairs.

    u    : (batch, bit)                 bf16 clamped minibatch codes
    y    : (batch, n_class)             bf16 minibatch labels
    bank : (bit + n_class, num_train)   bf16 fused feature-major [U.T ; Y.T]
    """
    batch = u.shape[0]
    n_class = y.shape[1]
    feat, num_train = bank.shape
    assert feat == bit + n_class
    itemsize = jnp.dtype(bank.dtype).itemsize

    tile_n = _DEFAULT_TILE_N if tile_n is None else tile_n
    tile_n = min(tile_n, num_train)
    if tile_n < num_train:
        # tile_n is the lane dimension of the bank block: multiple of 128.
        tile_n = max(128, (tile_n // 128) * 128)

    def _vmem_bytes(tn):
        # double-buffered bank tile + (batch, tn) f32 scratch accumulator
        return 2 * feat * tn * itemsize + batch * tn * 4

    # Shrink the tile if (e.g. for large batch) we would blow the VMEM budget.
    while tile_n > 512 and _vmem_bytes(tile_n) > _VMEM_BUDGET - (4 << 20):
        tile_n = max(512, tile_n // 2)

    total_tiles = pl.cdiv(num_train, tile_n)
    tail = num_train % tile_n

    kernel = functools.partial(
        _dpsh_likelihood_kernel,
        bit=bit, tail=tail, bf16_softplus=_BF16_SOFTPLUS)

    vmem_limit = int(min(max(_vmem_bytes(tile_n) + (4 << 20), 16 << 20),
                         _VMEM_BUDGET))

    out = pl.pallas_call(
        kernel,
        out_shape=jax.ShapeDtypeStruct((8, 128), jnp.float32),
        grid_spec=pltpu.PrefetchScalarGridSpec(
            num_scalar_prefetch=0,
            grid=(total_tiles,),
            in_specs=[
                pl.BlockSpec((batch, bit), lambda j: (0, 0)),       # resident
                pl.BlockSpec((batch, n_class), lambda j: (0, 0)),   # resident
                pl.BlockSpec((feat, tile_n), lambda j: (0, j)),     # streamed
            ],
            out_specs=pl.BlockSpec((8, 128), lambda j: (0, 0)),
            scratch_shapes=[pltpu.VMEM((batch, tile_n), jnp.float32)],
        ),
        compiler_params=pltpu.CompilerParams(
            dimension_semantics=("arbitrary",),   # bank axis is a reduction
            vmem_limit_bytes=vmem_limit,
        ),
    )(u, y, bank)

    return out[0, 0]


@functools.partial(jax.jit, static_argnames=("p", "tile_n"), donate_argnums=(3,))
def dpsh_loss_forward(u, y, ind, bank, alpha, *, p=2, tile_n=None):
    """JAX/Pallas equivalent of DPSHLoss.forward.

    `bank` is the fused feature-major [U.T ; Y.T] persistent state (bf16); it
    is DONATED so the scatter update is in place.  Returns (loss, new_bank),
    the functional stand-in for the in-place self.U / self.Y mutation.
    """
    batch, bit = u.shape
    num_train = bank.shape[1]

    u_f32 = jnp.clip(u.astype(jnp.float32), -1.0, 1.0)
    y_f32 = y.astype(jnp.float32)

    u_b = u_f32.astype(bank.dtype)
    y_b = y_f32.astype(bank.dtype)

    # self.U[ind, :] = u ; self.Y[ind, :] = y  — in-place column scatter into
    # the fused feature-major bank (donation avoids a full-bank HBM copy).
    bank = bank.at[:, ind].set(jnp.concatenate([u_b, y_b], axis=1).T)

    ll_sum = _likelihood_sum(u_b, y_b, bank, bit=bit, tile_n=tile_n)
    likelihood_loss = ll_sum / (batch * num_train)

    u_mean = jnp.mean(u_f32, axis=1)
    if p == 1:
        quantization_loss = alpha * jnp.mean(jnp.abs(u_mean))
    else:
        quantization_loss = alpha * jnp.mean(u_mean ** 2)

    return likelihood_loss + quantization_loss, bank


if __name__ == "__main__":
    # Small deterministic configuration consistent with the module.
    config = dict(num_train=3000, n_class=16, alpha=0.1, p=2)
    bit = 32
    batch = 8

    key = jax.random.PRNGKey(0)
    k_u, k_y, k_ind = jax.random.split(key, 3)

    u = jax.random.normal(k_u, (batch, bit), dtype=jnp.float32) * 1.5
    labels = jax.random.randint(k_y, (batch,), 0, config["n_class"])
    y = jax.nn.one_hot(labels, config["n_class"], dtype=jnp.float32)
    ind = jax.random.permutation(k_ind, config["num_train"])[:batch]

    # Persistent state: fused feature-major bank [U.T ; Y.T], zero-initialized
    # as in DPSHLoss.__init__ (bf16 storage; documented drift vs f32).
    bank = jnp.zeros((bit + config["n_class"], config["num_train"]),
                     dtype=jnp.bfloat16)
    alpha = jnp.float32(config["alpha"])

    # Run 1: small tile to exercise multi-tile streaming + edge-lane masking
    # (3000 is not a multiple of 1024).
    loss1, bank = dpsh_loss_forward(u, y, ind, bank, alpha,
                                    p=config["p"], tile_n=1024)
    # Run 2: generation-tuned tile size (single full-extent tile here).  The
    # bank rows are rewritten with the same values, so the loss is identical.
    loss2, bank = dpsh_loss_forward(u, y, ind, bank, alpha, p=config["p"])
    jax.block_until_ready(loss1)
    jax.block_until_ready(loss2)
    jax.block_until_ready(bank)

    # Pure-JAX f32 reference built from the updated bf16 bank.
    Uf = bank[:bit, :].astype(jnp.float32)            # (bit, num_train)
    Yf = bank[bit:, :].astype(jnp.float32)            # (n_class, num_train)
    u_c = jnp.clip(u, -1.0, 1.0)
    u_k = u_c.astype(jnp.bfloat16).astype(jnp.float32)   # what the kernel sees
    s_ref = (y @ Yf > 0).astype(jnp.float32)
    ip_ref = (u_k @ Uf) * 0.5
    ll_ref = jnp.mean(jnp.log1p(jnp.exp(-jnp.abs(ip_ref)))
                      + jnp.maximum(ip_ref, 0.0) - s_ref * ip_ref)
    q_ref = config["alpha"] * jnp.mean(jnp.mean(u_c, axis=1) ** 2)
    ref = ll_ref + q_ref

    # rtol covers the bf16 softplus path used on v6e/v7x (~0.3% drift).
    assert jnp.allclose(loss1, ref, rtol=1e-2, atol=1e-3), (loss1, ref)
    assert jnp.allclose(loss2, ref, rtol=1e-2, atol=1e-3), (loss2, ref)

    print("KERNEL_OK")
</pallas_src>

<mosaic_0001>
module attributes {stable_mosaic.version = 11 : i64} {
  func.func @_dpsh_likelihood_kernel(%arg0: i32, %arg1: memref<8x32xbf16, #tpu.memory_space<vmem>>, %arg2: memref<8x16xbf16, #tpu.memory_space<vmem>>, %arg3: memref<48x1024xbf16, #tpu.memory_space<vmem>>, %arg4: memref<8x128xf32, #tpu.memory_space<vmem>>, %arg5: memref<8x1024xf32, #tpu.memory_space<vmem>>) attributes {dimension_semantics = [#tpu.dimension_semantics<arbitrary>], iteration_bounds = array<i64: 3>, scalar_prefetch = 0 : i64, scratch_operands = 1 : i64, tpu.core_type = #tpu.core_type<tc>, window_params = [{pipeline_mode = #tpu.pipeline_mode<synchronous>, transform_indices = @transform_0, window_bounds = array<i64: 8, 32>}, {pipeline_mode = #tpu.pipeline_mode<synchronous>, transform_indices = @transform_1, window_bounds = array<i64: 8, 16>}, {transform_indices = @transform_2, window_bounds = array<i64: 48, 1024>}, {pipeline_mode = #tpu.pipeline_mode<synchronous>, transform_indices = @transform_3, window_bounds = array<i64: 8, 128>}]} {
    %c0_i32 = arith.constant 0 : i32
    %0 = arith.cmpi eq, %arg0, %c0_i32 : i32
    %1 = arith.extui %0 : i1 to i32
    %c0_i32_0 = arith.constant 0 : i32
    %2 = arith.cmpi ne, %1, %c0_i32_0 : i32
    scf.if %2 {
      %cst_16 = arith.constant 0.000000e+00 : f32
      %35 = vector.broadcast %cst_16 : f32 to vector<8x1024xf32>
      %c0_17 = arith.constant 0 : index
      %c0_18 = arith.constant 0 : index
      %36 = vector.load %arg5[%c0_17, %c0_18] : memref<8x1024xf32, #tpu.memory_space<vmem>>, vector<8x1024xf32>
      tpu.vector_store %arg5[%c0_17, %c0_18], %35 {strides = array<i32>} : memref<8x1024xf32, #tpu.memory_space<vmem>>, vector<8x1024xf32>,
    } else {
    }
    %c0 = arith.constant 0 : index
    %c0_1 = arith.constant 0 : index
    %3 = vector.load %arg3[%c0, %c0_1] : memref<48x1024xbf16, #tpu.memory_space<vmem>>, vector<48x1024xbf16>
    %4 = vector.extract_strided_slice %3 {offsets = [0, 0], sizes = [32, 1024], strides = [1, 1]} : vector<48x1024xbf16> to vector<32x1024xbf16>
    %5 = vector.extract_strided_slice %3 {offsets = [32, 0], sizes = [16, 1024], strides = [1, 1]} : vector<48x1024xbf16> to vector<16x1024xbf16>
    %c0_2 = arith.constant 0 : index
    %c0_3 = arith.constant 0 : index
    %6 = vector.load %arg1[%c0_2, %c0_3] : memref<8x32xbf16, #tpu.memory_space<vmem>>, vector<8x32xbf16>
    %cst = arith.constant dense<0.000000e+00> : vector<8x1024xf32>
    %7 = tpu.matmul %6, %4, %cst {dimension_numbers = #tpu.dot_dimension_numbers<[1], [0], [0], [1], [0, 0, 1, 1], [], []>} : vector<8x32xbf16>, vector<32x1024xbf16>, vector<8x1024xf32> -> vector<8x1024xf32>
    %cst_4 = arith.constant 5.000000e-01 : f32
    %8 = vector.broadcast %cst_4 : f32 to vector<8x1024xf32>
    %9 = arith.mulf %7, %8 : vector<8x1024xf32>
    %c0_5 = arith.constant 0 : index
    %c0_6 = arith.constant 0 : index
    %10 = vector.load %arg2[%c0_5, %c0_6] : memref<8x16xbf16, #tpu.memory_space<vmem>>, vector<8x16xbf16>
    %cst_7 = arith.constant dense<0.000000e+00> : vector<8x1024xf32>
    %11 = tpu.matmul %10, %5, %cst_7 {dimension_numbers = #tpu.dot_dimension_numbers<[1], [0], [0], [1], [0, 0, 1, 1], [], []>} : vector<8x16xbf16>, vector<16x1024xbf16>, vector<8x1024xf32> -> vector<8x1024xf32>
    %cst_8 = arith.constant 0.000000e+00 : f32
    %12 = vector.broadcast %cst_8 : f32 to vector<8x1024xf32>
    %13 = arith.cmpf ogt, %11, %12 : vector<8x1024xf32>
    %14 = arith.extui %13 : vector<8x1024xi1> to vector<8x1024xi32>
    %15 = arith.sitofp %14 : vector<8x1024xi32> to vector<8x1024xf32>
    %16 = math.absf %9 : vector<8x1024xf32>
    %cst_9 = arith.constant 0.000000e+00 : f32
    %17 = vector.broadcast %cst_9 : f32 to vector<8x1024xf32>
    %18 = arith.subf %17, %16 : vector<8x1024xf32>
    %19 = math.exp %18 : vector<8x1024xf32>
    %20 = math.log1p %19 : vector<8x1024xf32>
    %cst_10 = arith.constant 0.000000e+00 : f32
    %21 = vector.broadcast %cst_10 : f32 to vector<8x1024xf32>
    %22 = arith.maximumf %9, %21 : vector<8x1024xf32>
    %23 = arith.addf %20, %22 : vector<8x1024xf32>
    %24 = arith.mulf %15, %9 : vector<8x1024xf32>
    %25 = arith.subf %23, %24 : vector<8x1024xf32>
    %c2_i32 = arith.constant 2 : i32
    %26 = arith.cmpi slt, %arg0, %c2_i32 : i32
    %27 = arith.extui %26 : i1 to i32
    %c0_i32_11 = arith.constant 0 : i32
    %28 = arith.cmpi ne, %27, %c0_i32_11 : i32
    scf.if %28 {
      %c0_16 = arith.constant 0 : index
      %c0_17 = arith.constant 0 : index
      %35 = vector.load %arg5[%c0_16, %c0_17] : memref<8x1024xf32, #tpu.memory_space<vmem>>, vector<8x1024xf32>
      %36 = arith.addf %35, %25 : vector<8x1024xf32>
      %c0_18 = arith.constant 0 : index
      %c0_19 = arith.constant 0 : index
      %37 = vector.load %arg5[%c0_18, %c0_19] : memref<8x1024xf32, #tpu.memory_space<vmem>>, vector<8x1024xf32>
      tpu.vector_store %arg5[%c0_18, %c0_19], %36 {strides = array<i32>} : memref<8x1024xf32, #tpu.memory_space<vmem>>, vector<8x1024xf32>,
    } else {
    }
    %c2_i32_12 = arith.constant 2 : i32
    %29 = arith.cmpi eq, %arg0, %c2_i32_12 : i32
    %30 = arith.extui %29 : i1 to i32
    %c0_i32_13 = arith.constant 0 : i32
    %31 = arith.cmpi ne, %30, %c0_i32_13 : i32
    scf.if %31 {
      %35 = tpu.iota {dimensions = array<i32: 1>} : vector<8x1024xi32>
      %c0_16 = arith.constant 0 : index
      %c0_17 = arith.constant 0 : index
      %36 = vector.load %arg5[%c0_16, %c0_17] : memref<8x1024xf32, #tpu.memory_space<vmem>>, vector<8x1024xf32>
      %c952_i32 = arith.constant 952 : i32
      %37 = vector.broadcast %c952_i32 : i32 to vector<8x1024xi32>
      %38 = arith.cmpi slt, %35, %37 : vector<8x1024xi32>
      %cst_18 = arith.constant 0.000000e+00 : f32
      %39 = vector.broadcast %cst_18 : f32 to vector<8x1024xf32>
      %40 = arith.select %38, %25, %39 : vector<8x1024xi1>, vector<8x1024xf32>
      %41 = arith.addf %36, %40 : vector<8x1024xf32>
      %c0_19 = arith.constant 0 : index
      %c0_20 = arith.constant 0 : index
      %42 = vector.load %arg5[%c0_19, %c0_20] : memref<8x1024xf32, #tpu.memory_space<vmem>>, vector<8x1024xf32>
      tpu.vector_store %arg5[%c0_19, %c0_20], %41 {strides = array<i32>} : memref<8x1024xf32, #tpu.memory_space<vmem>>, vector<8x1024xf32>,
    } else {
    }
    %c2_i32_14 = arith.constant 2 : i32
    %32 = arith.cmpi eq, %arg0, %c2_i32_14 : i32
    %33 = arith.extui %32 : i1 to i32
    %c0_i32_15 = arith.constant 0 : i32
    %34 = arith.cmpi ne, %33, %c0_i32_15 : i32
    scf.if %34 {
      %c0_16 = arith.constant 0 : index
      %c0_17 = arith.constant 0 : index
      %35 = vector.load %arg5[%c0_16, %c0_17] : memref<8x1024xf32, #tpu.memory_space<vmem>>, vector<8x1024xf32>
      %36 = vector.shape_cast %35 : vector<8x1024xf32> to vector<1x8x1024xf32>
      %cst_18 = arith.constant dense<0.000000e+00> : vector<1xf32>
      %37 = vector.multi_reduction <add>, %36, %cst_18 [1, 2] : vector<1x8x1024xf32> to vector<1xf32>
      %38 = vector.shape_cast %37 : vector<1xf32> to vector<1x1x1xf32>
      %39 = vector.extract %38[0, 0, 0] : f32 from vector<1x1x1xf32>
      %40 = vector.broadcast %39 : f32 to vector<8x128xf32>
      %c0_19 = arith.constant 0 : index
      %c0_20 = arith.constant 0 : index
      %41 = vector.load %arg4[%c0_19, %c0_20] : memref<8x128xf32, #tpu.memory_space<vmem>>, vector<8x128xf32>
      tpu.vector_store %arg4[%c0_19, %c0_20], %40 {strides = array<i32>} : memref<8x128xf32, #tpu.memory_space<vmem>>, vector<8x128xf32>,
    } else {
    }
    return
  }
  func.func @transform_0(%arg0: i32) -> (i32, i32) {
    %c0_i32 = arith.constant 0 : i32
    %c0_i32_0 = arith.constant 0 : i32
    %c0_i32_1 = arith.constant 0 : i32
    return %c0_i32, %c0_i32_0 : i32, i32
  }
  func.func @transform_1(%arg0: i32) -> (i32, i32) {
    %c0_i32 = arith.constant 0 : i32
    %c0_i32_0 = arith.constant 0 : i32
    %c0_i32_1 = arith.constant 0 : i32
    return %c0_i32, %c0_i32_0 : i32, i32
  }
  func.func @transform_2(%arg0: i32) -> (i32, i32) {
    %c0_i32 = arith.constant 0 : i32
    %c0_i32_0 = arith.constant 0 : i32
    return %c0_i32, %arg0 : i32, i32
  }
  func.func @transform_3(%arg0: i32) -> (i32, i32) {
    %c0_i32 = arith.constant 0 : i32
    %c0_i32_0 = arith.constant 0 : i32
    %c0_i32_1 = arith.constant 0 : i32
    return %c0_i32, %c0_i32_0 : i32, i32
  }
}

</mosaic_0001>

<bundles_post_ra>
// kernel: dpsh_loss_forward.1
= control target key start
LH: loop header
LB: loop body
LE: loop exit
PB: predicated region body
PF: predicated region fallthrough
CT: control target
= control target key end

     0   :  { %s1189_s12 = smov 0   ;;  %s1191_s13 = smov 0   ;;  %s1483_s0 = inlined_call_operand.vmem [shape: bf16[8,32], index: 0, kind: input, shape index: {}]   ;;  %s1484_s1 = inlined_call_operand.vmem [shape: bf16[8,16], index: 1, kind: input, shape index: {}]   ;;  %s1485_s2 = inlined_call_operand.vmem [shape: bf16[48,3000], index: 2, kind: input, shape index: {}]   ;;  %s1486_s3 = inlined_call_operand.vmem [shape: f32[8,128], index: 3, kind: output, shape index: {}]  }
   0x1   :  { %s1193_s14 = smov 0  }
   0x2 LB: > { %s1205_s15 = sadd.s32 4294967295, %s1164_s14   ;;  %s1208_s16 = sadd.s32 1, %s1164_s14   ;;  %s1164_s14 = sphi %s1193_s14, %s1497_s14   ;;  %s1160_s13 = sphi %s1191_s13, %s1496_s13   ;;  %s1156_s12 = sphi %s1189_s12, %s1495_s12  }
   0x3   : > { %s59_s17 = ssub.s32 %s1164_s14, %s1208_s16  ;;  %s62_s18 = sadd.s32 1, %s1160_s13 }
   0x4   : > { %p60_p0 = scmp.eq.s32.totalorder %s59_s17, 0  ;;  %p69_p1 = scmp.ne.s32.totalorder %s1160_s13, %s1156_s12 }
   0x5   : > { %p70_p2 = scmp.eq.s32.totalorder %s1164_s14, 0  ;;  %p1029_p4 = scmp.ge.s32.totalorder %s1164_s14, 3 }
   0x6   : > { %s1217_s19 = scalar_select %p60_p0, %s1160_s13, %s62_s18  }
   0x7   : > { %p71_p3 = por %p70_p2, %p69_p1  ;;  %122 = sbr.rel (%p1029_p4) target bundleno = 31 (0x1f), region = 24 }
   0xe   : > { %125 = sbr.rel (!%p71_p3) target bundleno = 31 (0x1f), region = 28  ;;  %s127_s20 = sand.u32 (%p71_p3), 1, %s1160_s13  }
   0xf   : > { %s1078_s21 = sshll.u32 (%p71_p3), %s1164_s14, 5  ;;  %s1079_s22 = smul.u32 (%p71_p3), 192, %s127_s20 }
  0x10   : > { %s1225_s25 = scalar_lea.vmem (%p71_p3), %s1485_s2, %s1078_s21 }
  0x11   : > { %v145_v0 = vld [vmem:[%s1225_s25] sm:$0xff] (%p71_p3)  ;;  %v147_v1 = vld [vmem:[%s1225_s25 + $0x8] sm:$0xff] (%p71_p3)  ;;  %v149_v2 = vld [vmem:[%s1225_s25 + $0x10] sm:$0xff] (%p71_p3)  ;;  %s1233_s26 = scalar_lea.vmem (%p71_p3), [#allocation3], %s1079_s22 }
  0x12   : > { %v151_v3 = vld [vmem:[%s1225_s25 + $0x18] sm:$0xff] (%p71_p3)  ;;  %v153_v4 = vld [vmem:[%s1225_s25 + $0x60] sm:$0xff] (%p71_p3)  ;;  %v155_v5 = vld [vmem:[%s1225_s25 + $0x68] sm:$0xff] (%p71_p3)  ;;  %146 = vst [vmem:[%s1233_s26] sm:$0xff] (%p71_p3), %v145_v0 }
  0x13   : > { %148 = vst [vmem:[%s1233_s26 + $0x8] sm:$0xff] (%p71_p3), %v147_v1  ;;  %150 = vst [vmem:[%s1233_s26 + $0x10] sm:$0xff] (%p71_p3), %v149_v2  ;;  %v157_v6 = vld [vmem:[%s1225_s25 + $0x70] sm:$0xff] (%p71_p3)  ;;  %v159_v7 = vld [vmem:[%s1225_s25 + $0x78] sm:$0xff] (%p71_p3) }
  0x14   : > { %152 = vst [vmem:[%s1233_s26 + $0x18] sm:$0xff] (%p71_p3), %v151_v3  ;;  %154 = vst [vmem:[%s1233_s26 + $0x20] sm:$0xff] (%p71_p3), %v153_v4  ;;  %v161_v8 = vld [vmem:[%s1225_s25 + $0xc0] sm:$0xff] (%p71_p3)  ;;  %v163_v9 = vld [vmem:[%s1225_s25 + $0xc8] sm:$0xff] (%p71_p3) }
  0x15   : > { %156 = vst [vmem:[%s1233_s26 + $0x28] sm:$0xff] %v155_v5  ;;  %158 = vst [vmem:[%s1233_s26 + $0x30] sm:$0xff] %v157_v6  ;;  %v165_v10 = vld [vmem:[%s1225_s25 + $0xd0] sm:$0xff]  ;;  %v167_v11 = vld [vmem:[%s1225_s25 + $0xd8] sm:$0xff] }
  0x16   : > { %160 = vst [vmem:[%s1233_s26 + $0x38] sm:$0xff] %v159_v7  ;;  %162 = vst [vmem:[%s1233_s26 + $0x40] sm:$0xff] %v161_v8  ;;  %v169_v12 = vld [vmem:[%s1225_s25 + $0x120] sm:$0xff]  ;;  %v171_v13 = vld [vmem:[%s1225_s25 + $0x128] sm:$0xff] }
  0x17   : > { %164 = vst [vmem:[%s1233_s26 + $0x48] sm:$0xff] %v163_v9  ;;  %166 = vst [vmem:[%s1233_s26 + $0x50] sm:$0xff] %v165_v10  ;;  %v173_v14 = vld [vmem:[%s1225_s25 + $0x130] sm:$0xff]  ;;  %v175_v15 = vld [vmem:[%s1225_s25 + $0x138] sm:$0xff] }
  0x18   : > { %168 = vst [vmem:[%s1233_s26 + $0x58] sm:$0xff] %v167_v11  ;;  %170 = vst [vmem:[%s1233_s26 + $0x60] sm:$0xff] %v169_v12  ;;  %v177_v16 = vld [vmem:[%s1225_s25 + $0x180] sm:$0xff]  ;;  %v179_v17 = vld [vmem:[%s1225_s25 + $0x188] sm:$0xff] }
  0x19   : > { %172 = vst [vmem:[%s1233_s26 + $0x68] sm:$0xff] %v171_v13  ;;  %174 = vst [vmem:[%s1233_s26 + $0x70] sm:$0xff] %v173_v14  ;;  %v181_v18 = vld [vmem:[%s1225_s25 + $0x190] sm:$0xff]  ;;  %v183_v19 = vld [vmem:[%s1225_s25 + $0x198] sm:$0xff] }
  0x1a   : > { %176 = vst [vmem:[%s1233_s26 + $0x78] sm:$0xff] %v175_v15  ;;  %178 = vst [vmem:[%s1233_s26 + $0x80] sm:$0xff] %v177_v16  ;;  %v185_v20 = vld [vmem:[%s1225_s25 + $0x1e0] sm:$0xff]  ;;  %v187_v21 = vld [vmem:[%s1225_s25 + $0x1e8] sm:$0xff] }
  0x1b   : > { %180 = vst [vmem:[%s1233_s26 + $0x88] sm:$0xff] %v179_v17  ;;  %182 = vst [vmem:[%s1233_s26 + $0x90] sm:$0xff] %v181_v18  ;;  %v189_v22 = vld [vmem:[%s1225_s25 + $0x1f0] sm:$0xff]  ;;  %v191_v23 = vld [vmem:[%s1225_s25 + $0x1f8] sm:$0xff] }
  0x1c   : > { %184 = vst [vmem:[%s1233_s26 + $0x98] sm:$0xff] %v183_v19  ;;  %186 = vst [vmem:[%s1233_s26 + $0xa0] sm:$0xff] %v185_v20 }
  0x1d   : > { %188 = vst [vmem:[%s1233_s26 + $0xa8] sm:$0xff] %v187_v21  ;;  %190 = vst [vmem:[%s1233_s26 + $0xb0] sm:$0xff] %v189_v22 }
  0x1e   : > { %192 = vst [vmem:[%s1233_s26 + $0xb8] sm:$0xff] %v191_v23 }
  0x1f PF: > { %p1032_p5 = scmp.ge.s32.totalorder %s1164_s14, 1  ;;  %p197_p6 = scmp.lt.s32.totalorder %s1164_s14, 4 }
  0x21   : > { %p198_p7 = pnand %p1032_p5, %p197_p6 }
  0x22   : > { %s204_s27 = sand.u32 (!%p198_p7), 1, %s1156_s12   ;;  %p1033_p8 = scmp.ne.s32.totalorder (!%p198_p7), %s1205_s15, 0 }
  0x23   : > { %201 = sbr.rel (%p198_p7) target bundleno = 555 (0x22b), region = 51 }
  0x24   : > { %s1080_s28 = smul.u32 (!%p198_p7), 192, %s204_s27 }
  0x26   : > { %s1280_s29 = scalar_lea.vmem (!%p198_p7), [#allocation3], %s1080_s28 }
  0x2a   : > { %227 = sbr.rel (%p1033_p8) target bundleno = 49 (0x31), region = 59  ;;  %v1166_v24 = vmov (!%p1033_p8), 0.0  }
  0x2b   : > { %228 = vst [vmem:[#allocation2] sm:$0xff] (!%p1033_p8), %v1166_v24  ;;  %229 = vst [vmem:[#allocation2 + $0x8] sm:$0xff] (!%p1033_p8), %v1166_v24 }
  0x2c   : > { %230 = vst [vmem:[#allocation2 + $0x10] sm:$0xff] (!%p1033_p8), %v1166_v24  ;;  %231 = vst [vmem:[#allocation2 + $0x18] sm:$0xff] (!%p1033_p8), %v1166_v24 }
  0x2d   : > { %232 = vst [vmem:[#allocation2 + $0x20] sm:$0xff] (!%p1033_p8), %v1166_v24  ;;  %233 = vst [vmem:[#allocation2 + $0x28] sm:$0xff] (!%p1033_p8), %v1166_v24 }
  0x2e   : > { %234 = vst [vmem:[#allocation2 + $0x30] sm:$0xff] (!%p1033_p8), %v1166_v24  ;;  %235 = vst [vmem:[#allocation2 + $0x38] sm:$0xff] (!%p1033_p8), %v1166_v24 }
  0x31 PF: > { %v236_v25 = vld [vmem:[%s1280_s29] sm:$0xff]  ;;  %v237_v27 = vld [vmem:[%s1280_s29 + $0x8] sm:$0xff]  ;;  %v1167_v33 = vmov 0   ;;  %v238_v40 = vld [vmem:[%s1280_s29 + $0x10] sm:$0xff]  ;;  %vm341_vm0 = vcmask 261120   ;;  %vm558_vm1 = vcmask 130048  }
  0x32   : > { %v240_v26 = vld [vmem:[%s1280_s29 + $0x20] sm:$0xff]  ;;  %v241_v29 = vld [vmem:[%s1280_s29 + $0x28] sm:$0xff]  ;;  %377 = vmatprep.mubr.bf16.mxu0 %v1167_v33  ;;  %418 = vmatprep.mubr.bf16.mxu1 %v1167_v33  ;;  %v242_v41 = vld [vmem:[%s1280_s29 + $0x30] sm:$0xff]  ;;  %p1074_p9 = scmp.ge.s32.totalorder %s1205_s15, 2 }
  0x33   : > { %v1035_v28 = vcombine.high %v236_v25, %v240_v26  ;;  %v1034_v30 = vcombine.low %v236_v25, %v240_v26  ;;  %v244_v31 = vld [vmem:[%s1280_s29 + $0x40] sm:$0xff]  ;;  %v1037_v34 = vcombine.high %v237_v27, %v241_v29  ;;  %v1036_v35 = vcombine.low %v237_v27, %v241_v29  ;;  %v245_v37 = vld [vmem:[%s1280_s29 + $0x48] sm:$0xff]  ;;  %v239_v42 = vld [vmem:[%s1280_s29 + $0x18] sm:$0xff] }
  0x34   : > { %v248_v32 = vld [vmem:[%s1280_s29 + $0x60] sm:$0xff]  ;;  %v249_v38 = vld [vmem:[%s1280_s29 + $0x68] sm:$0xff]  ;;  %v243_v44 = vld [vmem:[%s1280_s29 + $0x38] sm:$0xff]  ;;  %v1039_v46 = vcombine.high %v238_v40, %v242_v41  ;;  %v1038_v53 = vcombine.low %v238_v40, %v242_v41 }
  0x35   : > { %v1043_v36 = vcombine.high %v244_v31, %v248_v32  ;;  %345 = vmatprep.subr.bf16.mxu0 %v1035_v28  ;;  %v1045_v39 = vcombine.high %v245_v37, %v249_v38  ;;  %386 = vmatprep.subr.bf16.mxu1 %v1037_v34  ;;  %v1042_v43 = vcombine.low %v244_v31, %v248_v32  ;;  %v246_v48 = vld [vmem:[%s1280_s29 + $0x50] sm:$0xff]  ;;  %v247_v50 = vld [vmem:[%s1280_s29 + $0x58] sm:$0xff]  ;;  %v260_v52 = vld [vmem:[%s1483_s0] sm:$0xf] }
  0x36   : > { %346 = vmatpush1.bf16.msra.mxu0 %v1034_v30  ;;  %387 = vmatpush1.bf16.msra.mxu1 %v1036_v35  ;;  %v1044_v45 = vcombine.low %v245_v37, %v249_v38  ;;  %v1041_v47 = vcombine.high %v239_v42, %v243_v44  ;;  %v250_v49 = vld [vmem:[%s1280_s29 + $0x70] sm:$0xff]  ;;  %v251_v51 = vld [vmem:[%s1280_s29 + $0x78] sm:$0xff]  ;;  %v1040_v54 = vcombine.low %v239_v42, %v243_v44  ;;  %v252_v57 = vld [vmem:[%s1280_s29 + $0x80] sm:$0xff] }
  0x37   : > { %347 = vmatprep.subr.bf16.mxu0 %v1043_v36  ;;  %388 = vmatprep.subr.bf16.mxu1 %v1045_v39  ;;  %v1047_v55 = vcombine.high %v246_v48, %v250_v49  ;;  %v1049_v56 = vcombine.high %v247_v50, %v251_v51  ;;  %v256_v58 = vld [vmem:[%s1280_s29 + $0xa0] sm:$0xff]  ;;  %v253_v59 = vld [vmem:[%s1280_s29 + $0x88] sm:$0xff]  ;;  %v1046_v61 = vcombine.low %v246_v48, %v250_v49  ;;  %v254_v1 = vld [vmem:[%s1280_s29 + $0x90] sm:$0xff] }
  0x38   : > { %v257_v60 = vld [vmem:[%s1280_s29 + $0xa8] sm:$0xff]  ;;  %v1048_v62 = vcombine.low %v247_v50, %v251_v51  ;;  %v1055_v63 = vcombine.high %v252_v57, %v256_v58  ;;  %v258_v2 = vld [vmem:[%s1280_s29 + $0xb0] sm:$0xff]  ;;  %v1054_v3 = vcombine.low %v252_v57, %v256_v58  ;;  %v255_v4 = vld [vmem:[%s1280_s29 + $0x98] sm:$0xff] }
  0x39   : > { %v1057_v0 = vcombine.high %v253_v59, %v257_v60  ;;  %v259_v5 = vld [vmem:[%s1280_s29 + $0xb8] sm:$0xff]  ;;  %v1056_v6 = vcombine.low %v253_v59, %v257_v60  ;;  %v1059_v7 = vcombine.high %v254_v1, %v258_v2  ;;  %v517_v9 = vld [vmem:[%s1484_s1] sm:$0xf]  ;;  %v1058_v10 = vcombine.low %v254_v1, %v258_v2 }
  0x3a   : > { %348 = vmatpush1.bf16.msra.mxu0 %v1042_v43  ;;  %389 = vmatpush1.bf16.msra.mxu1 %v1044_v45  ;;  %v1061_v8 = vcombine.high %v255_v4, %v259_v5  ;;  %v1060_v11 = vcombine.low %v255_v4, %v259_v5 }
  0x3b   : > { %427 = vmatprep.subr.bf16.mxu0 %v1039_v46  ;;  %468 = vmatprep.subr.bf16.mxu1 %v1041_v47 }
  0x3d   : > { %1050 = vmatmul.mubr.msk.bf16.vlgmr.msra.gmra.mrb[0].mxu0 %vm341_vm0, %v260_v52  ;;  %1051 = vmatmul.mubr.msk.bf16.vlgmr.msra.gmra.mrb[0].mxu1 %vm341_vm0, %v260_v52 }
  0x3e   : > { %428 = vmatpush1.bf16.msra.mxu0 %v1038_v53  ;;  %469 = vmatpush1.bf16.msra.mxu1 %v1040_v54 }
  0x3f   : > { %429 = vmatprep.subr.bf16.mxu0 %v1047_v55  ;;  %470 = vmatprep.subr.bf16.mxu1 %v1049_v56 }
  0x40   : > { %459 = vmatprep.mubr.bf16.mxu0 %v1167_v33  ;;  %500 = vmatprep.mubr.bf16.mxu1 %v1167_v33 }
  0x42   : > { %430 = vmatpush1.bf16.msra.mxu0 %v1046_v61  ;;  %471 = vmatpush1.bf16.msra.mxu1 %v1048_v62  ;;  %v1168_v62 = vmov 0.0  }
  0x43   : > { %562 = vmatprep.subr.bf16.mxu0 %v1055_v63  ;;  %603 = vmatprep.subr.bf16.mxu1 %v1057_v0 }
  0x45   : > { %1052 = vmatmul.mubr.msk.bf16.vlgmr.msra.gmra.mrb[4].mxu0 %vm341_vm0, %v260_v52  ;;  %1053 = vmatmul.mubr.msk.bf16.vlgmr.msra.gmra.mrb[4].mxu1 %vm341_vm0, %v260_v52 }
  0x46   : > { %563 = vmatpush1.bf16.msra.mxu0 %v1054_v3  ;;  %604 = vmatpush1.bf16.msra.mxu1 %v1056_v6 }
  0x47   : > { %594 = vmatprep.mubr.bf16.mxu0 %v1167_v33  ;;  %635 = vmatprep.mubr.bf16.mxu1 %v1167_v33 }
  0x48   : > { %644 = vmatprep.subr.bf16.mxu0 %v1059_v7  ;;  %685 = vmatprep.subr.bf16.mxu1 %v1061_v8 }
  0x4d   : > { %1062 = vmatmul.mubr.msk.bf16.vlgmr.msra.gmra.mrb[8].mxu0 %vm558_vm1, %v517_v9  ;;  %1063 = vmatmul.mubr.msk.bf16.vlgmr.msra.gmra.mrb[8].mxu1 %vm558_vm1, %v517_v9 }
  0x4e   : > { %645 = vmatpush1.bf16.msra.mxu0 %v1058_v10  ;;  %686 = vmatpush1.bf16.msra.mxu1 %v1060_v11 }
  0x4f   : > { %676 = vmatprep.mubr.bf16.mxu0 %v1167_v33  ;;  %717 = vmatprep.mubr.bf16.mxu1 %v1167_v33 }
  0x55   : > { %1064 = vmatmul.mubr.msk.bf16.vlgmr.msra.gmra.mrb[12].mxu0 %vm558_vm1, %v517_v9  ;;  %1065 = vmatmul.mubr.msk.bf16.vlgmr.msra.gmra.mrb[12].mxu1 %vm558_vm1, %v517_v9 }
 0x110   : > { %v379_v12 = vpop.f32.mrb[0].mxu0  ;;  %v420_v14 = vpop.f32.mrb[0].mxu1 }
 0x111   : > { %v1325_v13 = vmul.f32 0.5, %v379_v12  ;;  %v381_v15 = vpop.f32.mrb[1].mxu0  ;;  %v1327_v16 = vmul.f32 0.5, %v420_v14  ;;  %v422_v18 = vpop.f32.mrb[1].mxu1 }
 0x112   : > { %v1329_v17 = vmul.f32 0.5, %v381_v15  ;;  %v383_v19 = vpop.f32.mrb[2].mxu0  ;;  %v1332_v21 = vmul.f32 0.5, %v422_v18  ;;  %v424_v22 = vpop.f32.mrb[2].mxu1 }
 0x113   : > { %v750_v20 = vand.u32 2147483647, %v1325_v13  ;;  %v384_v23 = vpop.f32.mrb[3].mxu0  ;;  %v752_v24 = vand.u32 2147483647, %v1327_v16  ;;  %v425_v28 = vpop.f32.mrb[3].mxu1 }
 0x114   : > { %v751_v25 = vand.u32 2147483647, %v1329_v17  ;;  %v753_v27 = vand.u32 2147483647, %v1332_v21 }
 0x115   : > { %v758_v26 = vsub.f32 0.0, %v750_v20  ;;  %v760_v29 = vsub.f32 0.0, %v752_v24  ;;  %v854_v24 = vmax.f32 %v1325_v13, 0.0 }
 0x116   : > { %v759_v30 = vsub.f32 0.0, %v751_v25  ;;  %v761_v32 = vsub.f32 0.0, %v753_v27  ;;  %v856_v25 = vmax.f32 %v1327_v16, 0.0 }
 0x117   : > { %v766_v31 = vmul.f32 1.442695, %v758_v26  ;;  %v770_v33 = vmul.f32 1.442695, %v760_v29  ;;  %v855_v26 = vmax.f32 %v1329_v17, 0.0 }
 0x118   : > { %v768_v34 = vmul.f32 1.442695, %v759_v30  ;;  %v461_v35 = vpop.f32.mrb[4].mxu0  ;;  %v772_v36 = vmul.f32 1.442695, %v761_v32  ;;  %v502_v38 = vpop.f32.mrb[4].mxu1 }
 0x119   : > { %1110 = vpow2.f32 %v766_v31  ;;  %v1337_v37 = vmul.f32 0.5, %v461_v35  ;;  %v463_v39 = vpop.f32.mrb[5].mxu0  ;;  %v1339_v40 = vmul.f32 0.5, %v502_v38  ;;  %v504_v42 = vpop.f32.mrb[5].mxu1 }
 0x11a   : > { %1112 = vpow2.f32 %v770_v33  ;;  %v1341_v41 = vmul.f32 0.5, %v463_v39  ;;  %v465_v43 = vpop.f32.mrb[6].mxu0  ;;  %v1344_v45 = vmul.f32 0.5, %v504_v42  ;;  %v506_v46 = vpop.f32.mrb[6].mxu1 }
 0x11b   : > { %1114 = vpow2.f32 %v768_v34  ;;  %v754_v44 = vand.u32 2147483647, %v1337_v37  ;;  %v466_v47 = vpop.f32.mrb[7].mxu0  ;;  %v756_v48 = vand.u32 2147483647, %v1339_v40  ;;  %v507_v50 = vpop.f32.mrb[7].mxu1 }
 0x11c   : > { %1116 = vpow2.f32 %v772_v36  ;;  %v755_v49 = vand.u32 2147483647, %v1341_v41  ;;  %v757_v52 = vand.u32 2147483647, %v1344_v45 }
 0x11d   : > { %v762_v51 = vsub.f32 0.0, %v754_v44  ;;  %v764_v53 = vsub.f32 0.0, %v756_v48  ;;  %v857_v48 = vmax.f32 %v1332_v21, 0.0 }
 0x11e   : > { %v763_v54 = vsub.f32 0.0, %v755_v49  ;;  %v765_v58 = vsub.f32 0.0, %v757_v52 }
 0x11f   : > { %v774_v55 = vmul.f32 1.442695, %v762_v51  ;;  %v778_v56 = vmul.f32 1.442695, %v764_v53 }
 0x120   : > { %v776_v57 = vmul.f32 1.442695, %v763_v54  ;;  %v596_v59 = vpop.f32.mrb[8].mxu0  ;;  %v637_v60 = vpop.f32.mrb[8].mxu1  ;;  %v780_v8 = vmul.f32 1.442695, %v765_v58 }
 0x121   : > { %1118 = vpow2.f32 %v774_v55  ;;  %vm726_vm2 = vcmp.gt.f32.partialorder %v596_v59, 0.0  ;;  %v598_v61 = vpop.f32.mrb[9].mxu0  ;;  %vm728_vm3 = vcmp.gt.f32.partialorder %v637_v60, 0.0  ;;  %v639_v0 = vpop.f32.mrb[9].mxu1 }
 0x122   : > { %1120 = vpow2.f32 %v778_v56  ;;  %v1066_v63 = vsel %vm726_vm2, 1.0, %v1168_v62  ;;  %vm727_vm4 = vcmp.gt.f32.partialorder %v598_v61, 0.0  ;;  %v600_v1 = vpop.f32.mrb[10].mxu0  ;;  %v1068_v4 = vsel %vm728_vm3, 1.0, %v1168_v62  ;;  %v641_v5 = vpop.f32.mrb[10].mxu1 }
 0x123   : > { %v1111_v2 = vpop.eup %1110  ;;  %1122 = vpow2.f32 %v776_v57  ;;  %v1351_v3 = vmul.f32 %v1066_v63, %v1325_v13  ;;  %v601_v6 = vpop.f32.mrb[11].mxu0  ;;  %v1357_v15 = vmul.f32 %v1068_v4, %v1327_v16  ;;  %v1067_v18 = vsel %vm727_vm4, 1.0, %v1168_v62 }
 0x124   : > { %v1113_v7 = vpop.eup %1112  ;;  %v782_v9 = vadd.f32 1.0, %v1111_v2  ;;  %v642_v10 = vpop.f32.mrb[11].mxu1  ;;  %v785_v12 = vmul.f32 -0.5, %v1111_v2  ;;  %v788_v20 = vand.u32 2147483647, %v1111_v2  ;;  %v1368_v28 = vmul.f32 %v1067_v18, %v1329_v17 }
 0x125   : > { %v1354_v11 = vpop.eup %1114  ;;  %v800_v14 = vadd.f32 1.0, %v1113_v7  ;;  %v803_v22 = vmul.f32 -0.5, %v1113_v7  ;;  %v806_v27 = vand.u32 2147483647, %v1113_v7  ;;  %vm729_vm5 = vcmp.gt.f32.partialorder %v639_v0, 0.0 }
 0x126   : > { %v1361_v19 = vpop.eup %1116  ;;  %1124 = vlog2.f32 %v782_v9  ;;  %v791_v23 = vadd.f32 1.0, %v1354_v11  ;;  %v794_v30 = vmul.f32 -0.5, %v1354_v11  ;;  %v786_v34 = vadd.f32 1.0, %v785_v12 }
 0x127   : > { %1126 = vlog2.f32 %v800_v14  ;;  %v809_v31 = vadd.f32 1.0, %v1361_v19  ;;  %vm1372_vm6 = vcmp.lt.f32.partialorder %v788_v20, 0.0004427343  ;;  %v804_v36 = vadd.f32 1.0, %v803_v22 }
 0x128   : > { %1128 = vlog2.f32 %v791_v23  ;;  %v678_v29 = vpop.f32.mrb[12].mxu0  ;;  %v719_v32 = vpop.f32.mrb[12].mxu1  ;;  %v1069_v38 = vsel %vm729_vm5, 1.0, %v1168_v62  ;;  %v812_v42 = vmul.f32 -0.5, %v1361_v19  ;;  %v797_v49 = vand.u32 2147483647, %v1354_v11 }
 0x129   : > { %1130 = vpow2.f32 %v780_v8  ;;  %v680_v33 = vpop.f32.mrb[13].mxu0  ;;  %v1381_v43 = vmul.f32 %v1069_v38, %v1332_v21  ;;  %vm730_vm7 = vcmp.gt.f32.partialorder %v678_v29, 0.0  ;;  %v721_v44 = vpop.f32.mrb[13].mxu1  ;;  %v795_v54 = vadd.f32 1.0, %v794_v30 }
 0x12a   : > { %1132 = vlog2.f32 %v809_v31  ;;  %v682_v46 = vpop.f32.mrb[14].mxu0  ;;  %v1070_v50 = vsel %vm730_vm7, 1.0, %v1168_v62  ;;  %v723_v52 = vpop.f32.mrb[14].mxu1  ;;  %v815_v55 = vand.u32 2147483647, %v1361_v19  ;;  %vm732_vm8 = vcmp.gt.f32.partialorder %v719_v32, 0.0 }
 0x12b   : > { %v1377_v39 = vpop.eup %1118  ;;  %v1393_v56 = vmul.f32 %v1070_v50, %v1337_v37  ;;  %v683_v57 = vpop.f32.mrb[15].mxu0  ;;  %vm1395_vm9 = vcmp.lt.f32.partialorder %v806_v27, 0.0004427343  ;;  %v1072_v59 = vsel %vm732_vm8, 1.0, %v1168_v62  ;;  %v787_v61 = vmul.f32 %v1111_v2, %v786_v34 }
 0x12c   : > { %v1383_v47 = vpop.eup %1120  ;;  %v818_v51 = vadd.f32 1.0, %v1377_v39  ;;  %v724_v58 = vpop.f32.mrb[15].mxu1  ;;  %v805_v63 = vmul.f32 %v1113_v7, %v804_v36  ;;  %v813_v0 = vadd.f32 1.0, %v812_v42  ;;  %v821_v1 = vmul.f32 -0.5, %v1377_v39 }
 0x12d   : > { %v1389_v53 = vpop.eup %1122  ;;  %v836_v60 = vadd.f32 1.0, %v1383_v47  ;;  %v1403_v5 = vmul.f32 %v1072_v59, %v1339_v40  ;;  %vm731_vm10 = vcmp.gt.f32.partialorder %v680_v33, 0.0  ;;  %v796_v10 = vmul.f32 %v1354_v11, %v795_v54 }
 0x12e   : > { %1134 = vlog2.f32 %v818_v51  ;;  %v827_v6 = vadd.f32 1.0, %v1389_v53  ;;  %vm1407_vm11 = vcmp.lt.f32.partialorder %v797_v49, 0.0004427343  ;;  %vm1411_vm12 = vcmp.lt.f32.partialorder %v815_v55, 0.0004427343 }
 0x12f   : > { %1136 = vlog2.f32 %v836_v60  ;;  %v824_v18 = vand.u32 2147483647, %v1377_v39  ;;  %v1071_v20 = vsel %vm731_vm10, 1.0, %v1168_v62  ;;  %v814_v27 = vmul.f32 %v1361_v19, %v813_v0 }
 0x130   : > { %v1125_v4 = vpop.eup %1124  ;;  %1138 = vlog2.f32 %v827_v6  ;;  %v839_v29 = vmul.f32 -0.5, %v1383_v47  ;;  %v822_v32 = vadd.f32 1.0, %v821_v1  ;;  %v875_v33 = vmul.f32 %v1071_v20, %v1341_v41  ;;  %v892_v20 = vld [vmem:[#allocation2 + $0x10] sm:$0xff] (!%p1074_p9) }
 0x131   : > { %v1127_v8 = vpop.eup %1126  ;;  %v784_v9 = vmul.f32 0.6931472, %v1125_v4  ;;  %v830_v19 = vmul.f32 -0.5, %v1389_v53  ;;  %vm733_vm13 = vcmp.gt.f32.partialorder %v721_v44, 0.0  ;;  %v842_v42 = vand.u32 2147483647, %v1383_v47 }
 0x132   : > { %v1129_v7 = vpop.eup %1128  ;;  %v802_v14 = vmul.f32 0.6931472, %v1127_v8  ;;  %v840_v16 = vadd.f32 1.0, %v839_v29  ;;  %v823_v17 = vmul.f32 %v1377_v39, %v822_v32  ;;  %v858_v55 = vmax.f32 %v1337_v37, 0.0  ;;  %v895_v29 = vld [vmem:[#allocation2 + $0x28] sm:$0xff] (!%p1074_p9)  ;;  %v896_v32 = vld [vmem:[#allocation2 + $0x30] sm:$0xff] (!%p1074_p9) }
 0x133   : > { %v1131_v22 = vpop.eup %1130  ;;  %v790_v23 = vsel %vm1372_vm6, %v787_v61, %v784_v9  ;;  %v793_v11 = vmul.f32 0.6931472, %v1129_v7  ;;  %v831_v54 = vadd.f32 1.0, %v830_v19  ;;  %vm825_vm14 = vcmp.lt.f32.partialorder %v824_v18, 0.0004427343  ;;  %v891_v18 = vld [vmem:[#allocation2 + $0x8] sm:$0xff] (!%p1074_p9) }
 0x134   : > { %v862_v30 = vadd.f32 %v854_v24, %v790_v23  ;;  %v808_v31 = vsel %vm1395_vm9, %v805_v63, %v802_v14  ;;  %v1133_v34 = vpop.eup %1132  ;;  %v845_v49 = vadd.f32 1.0, %v1131_v22  ;;  %v841_v21 = vmul.f32 %v1383_v47, %v840_v16 }
 0x135   : > { %v864_v36 = vadd.f32 %v856_v25, %v808_v31  ;;  %v799_v35 = vsel %vm1407_vm11, %v796_v10, %v793_v11  ;;  %v811_v24 = vmul.f32 0.6931472, %v1133_v34  ;;  %v1073_v25 = vsel %vm733_vm13, 1.0, %v1168_v62 }
 0x136   : > { %v1432_v38 = vsub.f32 %v862_v30, %v1351_v3  ;;  %v863_v13 = vadd.f32 %v855_v26, %v799_v35  ;;  %v877_v26 = vmul.f32 %v1073_v25, %v1344_v45  ;;  %1140 = vlog2.f32 %v845_v49 }
 0x137   : > { %v1438_v46 = vsub.f32 %v864_v36, %v1357_v15  ;;  %v817_v3 = vsel %vm1411_vm12, %v814_v27, %v811_v24  ;;  %v833_v62 = vand.u32 2147483647, %v1389_v53  ;;  %v860_v59 = vmax.f32 %v1339_v40, 0.0  ;;  %v893_v27 = vld [vmem:[#allocation2 + $0x18] sm:$0xff] (!%p1074_p9) }
 0x138   : > { %v1135_v50 = vpop.eup %1134  ;;  %v1442_v51 = vsub.f32 %v863_v13, %v1368_v28  ;;  %v865_v44 = vadd.f32 %v857_v48, %v817_v3  ;;  %vm843_vm15 = vcmp.lt.f32.partialorder %v842_v42, 0.0004427343  ;;  %v848_v60 = vmul.f32 -0.5, %v1131_v22 }
 0x139   : > { %v820_v52 = vmul.f32 0.6931472, %v1135_v50  ;;  %v1137_v15 = vpop.eup %1136  ;;  %v832_v37 = vmul.f32 %v1389_v53, %v831_v54  ;;  %v859_v0 = vmax.f32 %v1341_v41, 0.0  ;;  %vm834_vm0 = vcmp.lt.f32.partialorder %v833_v62, 0.0004427343 }
 0x13a   : > { %v1451_v28 = vsub.f32 %v865_v44, %v1381_v43  ;;  %v838_v58 = vmul.f32 0.6931472, %v1137_v15  ;;  %v1139_v39 = vpop.eup %1138  ;;  %v849_v8 = vadd.f32 1.0, %v848_v60  ;;  %v851_v9 = vand.u32 2147483647, %v1131_v22 }
 0x13b   : > { %v826_v57 = vsel %vm825_vm14, %v823_v17, %v820_v52  ;;  %v829_v63 = vmul.f32 0.6931472, %v1139_v39  ;;  %v861_v7 = vmax.f32 %v1344_v45, 0.0  ;;  %v899_v23 = vadd.f32 (!%p1074_p9), %v891_v18, %v1442_v51 }
 0x13c   : > { %v866_v48 = vadd.f32 %v858_v55, %v826_v57  ;;  %v844_v61 = vsel %vm843_vm15, %v841_v21, %v838_v58  ;;  %v850_v2 = vmul.f32 %v1131_v22, %v849_v8  ;;  %vm852_vm1 = vcmp.lt.f32.partialorder %v851_v9, 0.0004427343  ;;  %v894_v22 = vld [vmem:[#allocation2 + $0x20] sm:$0xff] (!%p1074_p9) }
 0x13d   : > { %v868_v43 = vadd.f32 %v860_v59, %v844_v61  ;;  %v835_v4 = vsel %vm834_vm0, %v832_v37, %v829_v63  ;;  %v900_v11 = vadd.f32 (!%p1074_p9), %v892_v20, %v1438_v46  ;;  %v901_v45 = vadd.f32 (!%p1074_p9), %v893_v27, %v1451_v28  ;;  %907 = vst [vmem:[#allocation2 + $0x8] sm:$0xff] (!%p1074_p9), %v899_v23 }
 0x13e   : > { %v882_v1 = vsub.f32 %v866_v48, %v1393_v56  ;;  %v867_v47 = vadd.f32 %v859_v0, %v835_v4  ;;  %v890_v56 = vld [vmem:[#allocation2] sm:$0xff] (!%p1074_p9) }
 0x13f   : > { %v884_v6 = vsub.f32 %v868_v43, %v1403_v5  ;;  %v898_v5 = vadd.f32 (!%p1074_p9), %v890_v56, %v1432_v38  ;;  %908 = vst [vmem:[#allocation2 + $0x10] sm:$0xff] (!%p1074_p9), %v900_v11  ;;  %909 = vst [vmem:[#allocation2 + $0x18] sm:$0xff] (!%p1074_p9), %v901_v45 }
 0x140   : > { %v883_v40 = vsub.f32 %v867_v47, %v875_v33  ;;  %v1141_v10 = vpop.eup %1140  ;;  %889 = sbr.rel (%p1074_p9) target bundleno = 331 (0x14b), region = 63  ;;  %v902_v30 = vadd.f32 (!%p1074_p9), %v894_v22, %v882_v1  ;;  %v897_v33 = vld [vmem:[#allocation2 + $0x38] sm:$0xff] (!%p1074_p9) }
 0x141   : > { %v847_v12 = vmul.f32 0.6931472, %v1141_v10  ;;  %906 = vst [vmem:[#allocation2] sm:$0xff] (!%p1074_p9), %v898_v5  ;;  %v904_v34 = vadd.f32 (!%p1074_p9), %v896_v32, %v884_v6 }
 0x142   : > { %v903_v31 = vadd.f32 (!%p1074_p9), %v895_v29, %v883_v40  ;;  %910 = vst [vmem:[#allocation2 + $0x20] sm:$0xff] (!%p1074_p9), %v902_v30 }
 0x143   : > { %v853_v53 = vsel %vm852_vm1, %v850_v2, %v847_v12  ;;  %912 = vst [vmem:[#allocation2 + $0x30] sm:$0xff] (!%p1074_p9), %v904_v34 }
 0x144   : > { %v869_v14 = vadd.f32 %v861_v7, %v853_v53  ;;  %911 = vst [vmem:[#allocation2 + $0x28] sm:$0xff] (!%p1074_p9), %v903_v31 }
 0x146   : > { %v885_v41 = vsub.f32 %v869_v14, %v877_v26 }
 0x148   : > { %v905_v36 = vadd.f32 %v897_v33, %v885_v41 }
 0x14a   : > { %913 = vst [vmem:[#allocation2 + $0x38] sm:$0xff] %v905_v36 }
 0x14b PF: > { %p1075_p10 = scmp.ne.s32.totalorder %s1205_s15, 2 }
 0x14c   : > { %v918_v35 = vlaneseq (!%p1075_p10)  ;;  %v927_v19 = vld [vmem:[#allocation2] sm:$0xff] (!%p1075_p10)  ;;  %v928_v13 = vld [vmem:[#allocation2 + $0x8] sm:$0xff] (!%p1075_p10)  ;;  %v929_v24 = vld [vmem:[#allocation2 + $0x10] sm:$0xff] (!%p1075_p10) }
 0x14d   : > { %917 = sbr.rel (%p1075_p10) target bundleno = 555 (0x22b), region = 67  ;;  %v930_v42 = vld [vmem:[#allocation2 + $0x18] sm:$0xff] (!%p1075_p10)  ;;  %v931_v16 = vld [vmem:[#allocation2 + $0x20] sm:$0xff] (!%p1075_p10)  ;;  %v951_v49 = vadd.f32 (!%p1075_p10), %v927_v19, %v1432_v38  ;;  %v952_v50 = vadd.f32 (!%p1075_p10), %v928_v13, %v1442_v51  ;;  %v953_v3 = vadd.f32 (!%p1075_p10), %v929_v24, %v1438_v46 }
 0x14e   : > { %v919_v17 = vand.u32 (!%p1075_p10), 127, %v918_v35  ;;  %v933_v26 = vld [vmem:[#allocation2 + $0x30] sm:$0xff] (!%p1075_p10)  ;;  %v954_v44 = vadd.f32 (!%p1075_p10), %v930_v42, %v1451_v28  ;;  %v955_v52 = vadd.f32 (!%p1075_p10), %v931_v16, %v882_v1 }
 0x14f   : > { %v932_v25 = vld [vmem:[#allocation2 + $0x28] sm:$0xff] (!%p1075_p10)  ;;  %v957_v15 = vadd.f32 (!%p1075_p10), %v933_v26, %v884_v6  ;;  %959 = vst [vmem:[#allocation2] sm:$0xff] (!%p1075_p10), %v951_v49  ;;  %960 = vst [vmem:[#allocation2 + $0x8] sm:$0xff] (!%p1075_p10), %v952_v50  ;;  %v975_v55 = vadd.f32 (!%p1075_p10), %v952_v50, %v951_v49 }
 0x150   : > { %v956_v54 = vadd.f32 (!%p1075_p10), %v932_v25, %v883_v40  ;;  %961 = vst [vmem:[#allocation2 + $0x10] sm:$0xff] (!%p1075_p10), %v953_v3  ;;  %v926_v62 = vadd.s32 (!%p1075_p10), 896, %v919_v17  ;;  %962 = vst [vmem:[#allocation2 + $0x18] sm:$0xff] (!%p1075_p10), %v954_v44 }
 0x151   : > { %963 = vst [vmem:[#allocation2 + $0x20] sm:$0xff] (!%p1075_p10), %v955_v52  ;;  %v934_v38 = vld [vmem:[#allocation2 + $0x38] sm:$0xff] (!%p1075_p10)  ;;  %965 = vst [vmem:[#allocation2 + $0x30] sm:$0xff] (!%p1075_p10), %v957_v15  ;;  %v976_v51 = vadd.f32 (!%p1075_p10), %v975_v55, %v953_v3 }
 0x152   : > { %964 = vst [vmem:[#allocation2 + $0x28] sm:$0xff] (!%p1075_p10), %v956_v54  ;;  %vm942_vm2 = vcmp.lt.s32.totalorder (!%p1075_p10), %v926_v62, 952 }
 0x153   : > { %v950_v46 = vsel (!%p1075_p10), %vm942_vm2, %v885_v41, 0.0  ;;  %v977_v57 = vadd.f32 (!%p1075_p10), %v976_v51, %v954_v44 }
 0x154   : > { %v958_v58 = vadd.f32 %v950_v46, %v934_v38 }
 0x155   : > { %v978_v21 = vadd.f32 %v977_v57, %v955_v52 }
 0x156   : > { %966 = vst [vmem:[#allocation2 + $0x38] sm:$0xff] %v958_v58 }
 0x157   : > { %v979_v28 = vadd.f32 %v978_v21, %v956_v54 }
 0x159   : > { %v980_v39 = vadd.f32 %v979_v28, %v957_v15 }
 0x15b   : > { %v981_v59 = vadd.f32 %v980_v39, %v958_v58 }
 0x15d   : > { %982 = vadd.xlane.f32.xlu0 %v981_v59 }
 0x1ea   : > { %v983_v48 = vpop.xlane.xlu0 %982 }
 0x1eb   : > { %v984_v60 = vrot.slane %v983_v48, 4 }
 0x1ed   : > { %v985_v61 = vadd.f32 %v984_v60, %v983_v48 }
 0x1ef   : > { %v986_v63 = vrot.slane %v985_v61, 2 }
 0x1f1   : > { %v987_v37 = vadd.f32 %v986_v63, %v985_v61 }
 0x1f3   : > { %v988_v0 = vrot.slane %v987_v37, 1 }
 0x1f5   : > { %v989_v1 = vadd.f32 %v988_v0, %v987_v37 }
 0x1f7   : > { %1081 = vpush %v989_v1 }
 0x228   : > { %s1082_s7 = spop %1081 }
 0x229   : > { %v991_v43 = vstv %s1082_s7 }
 0x22a   : > { %992 = vst [vmem:[%s1486_s3] sm:$0xff] %v991_v43 }
 0x22b PF: > { %p10_p11 = scmp.ge.s32.totalorder %s1208_s16, 5   ;;  %s1495_s12 = smov %s1160_s13 }
 0x22c   : > { %s1496_s13 = smov %s1217_s19  ;;  %s1497_s14 = smov %s1208_s16 }
 0x22d   :  { %12 = sbr.rel (!%p10_p11) target bundleno = 2 (0x2), region = 98 }

</bundles_post_ra>
